<compile_context>
chip_gen: v6e
topology: v6e:2x2x1
jax: 0.10.0
libtpu: 0.0.40
codegen_flags: <defaults>
</compile_context>

<pallas_src>
import functools

import numpy as np
import jax
import jax.numpy as jnp
from jax import lax
from jax.experimental import pallas as pl
from jax.experimental.pallas import tpu as pltpu


# ---------------------------------------------------------------------------
# Init-time helpers (numpy / plain JAX) — mirror the PyTorch module's __init__
# ---------------------------------------------------------------------------

def linear_approx_relu(t_phi, phi, resolution):
    """Mirror of FRIED-Net linearApproxReLU (runs once at parameter-build time)."""
    t_phi = np.asarray(t_phi).squeeze()
    phi = np.asarray(phi).squeeze()
    T_s = t_phi[1] - t_phi[0]
    stride = int(1 / (T_s * resolution))
    T_int = 1 / resolution
    b_relu = t_phi[::stride]
    b_relu = np.append(b_relu, b_relu[-1] + T_int)
    b_relu = -b_relu
    phi_s = np.append(phi[::stride], phi[0])
    init_val = np.array(phi_s[0])
    delta_phi = np.diff(phi_s)
    grad = delta_phi / T_int
    c_relu = np.diff(grad)
    c_relu = np.append(grad[0], c_relu)
    c_relu = np.append(c_relu, -np.sum(c_relu))
    knots = c_relu.shape[0]
    return c_relu, b_relu, init_val, knots


def compute_peak_phi(c, init_val, resolution):
    """Mirror of computePeakPhi (ReLU branch). Host-side glue for norm_phi."""
    phi = jnp.cumsum(jnp.cumsum(c)) / resolution + init_val
    mx, mn = phi.max(), phi.min()
    return jnp.where(jnp.abs(mx) >= jnp.abs(mn), mx, mn)


def build_decoder_params(key, *, N, K, resolution, train_decoder=True, norm_phi=False):
    """Recreate decoderReLUNet.__init__ + the per-forward weight assembly.

    Returns:
      kernel_params = (shifts_p, coeffs_p, inits_p)
        shifts_p: (K_total, KN, 1)  per-pulse -t_phi shifts (zero padded)
        coeffs_p: (K_total, KN, 1)  per-pulse c_ReLU (zero padded -> 0 contribution)
        inits_p : (K_total, 1, 1)   per-pulse phi init value
      ref_params = (w1t, b1, w3t, b3) dense block-diag weights, ONLY for the
        pure-JAX reference (they mirror layers[0].weight.T / bias and
        layer3weight.T / layer3bias of the PyTorch module).
    init_phi[i] is taken as falsy -> phi == 0 grid, c_ReLU ~ U(-0.01, 0.01).
    """
    K_total = int(sum(K))
    c_list, shift_list, init_list, knots_list = [], [], [], []
    for _k in K:
        t_phi = np.arange(0.0, N, 1.0 / resolution)
        phi = np.zeros_like(t_phi)
        _, b_relu, init_val, knots = linear_approx_relu(t_phi, phi, resolution)
        key, sub = jax.random.split(key)
        c = jax.random.uniform(sub, (knots,), jnp.float32, -0.01, 0.01)
        init_j = jnp.float32(init_val)
        if train_decoder:
            if norm_phi:
                peak = compute_peak_phi(c, init_j, resolution)
                c = c / peak
                init_j = init_j / peak
            c = c.at[-1].set(-jnp.sum(c[:-1]))          # i.data[-1] = -sum(i[:-1])
        c_list.append(np.asarray(c, dtype=np.float32))
        shift_list.append(np.asarray(b_relu, dtype=np.float32))
        init_list.append(float(init_j))
        knots_list.append(int(knots))

    # --- per-pulse padded params for the Pallas kernel (block-diag exploited) ---
    KN = max(knots_list)
    shifts_p = np.zeros((K_total, KN, 1), np.float32)
    coeffs_p = np.zeros((K_total, KN, 1), np.float32)   # zero pad => padded knots add 0
    inits_p = np.zeros((K_total, 1, 1), np.float32)
    row = 0
    for i, k in enumerate(K):
        kn = knots_list[i]
        for _ in range(k):
            shifts_p[row, :kn, 0] = shift_list[i]
            coeffs_p[row, :kn, 0] = c_list[i]
            inits_p[row, 0, 0] = init_list[i]
            row += 1

    # --- dense block-diagonal weights, reference only ---
    knots_tot = int(sum(kn * k for kn, k in zip(knots_list, K)))
    w1t = np.zeros((K_total, knots_tot), np.float32)
    b1 = np.zeros((knots_tot,), np.float32)
    w3t = np.zeros((knots_tot, K_total), np.float32)
    b3 = np.zeros((K_total,), np.float32)
    row, col = 0, 0
    for i, k in enumerate(K):
        kn = knots_list[i]
        for _ in range(k):
            w1t[row, col:col + kn] = 1.0
            b1[col:col + kn] = shift_list[i]
            w3t[col:col + kn, row] = c_list[i]
            b3[row] = init_list[i]
            row += 1
            col += kn

    kernel_params = tuple(jnp.asarray(a) for a in (shifts_p, coeffs_p, inits_p))
    ref_params = tuple(jnp.asarray(a) for a in (w1t, b1, w3t, b3))
    return kernel_params, ref_params


# ---------------------------------------------------------------------------
# Pallas kernel
# ---------------------------------------------------------------------------

def _decoder_relu_kernel(tk_ref, shift_ref, c_ref, b3_ref, out_ref,
                         *, N, T, N_tile, TB, KN, M_CHUNK, periodic):
    """Grid point (pulse j, batch tile bi, time tile ni).

    Block shapes:
      tk_ref:    (1, TB, 1)        t_k_hat[batch tile, pulse j]
      shift_ref: (1, KN, 1)        -t_phi shifts for pulse j's group (zero padded)
      c_ref:     (1, KN, 1)        c_ReLU coefficients (zero padded)
      b3_ref:    (1, 1, 1)         phi init value for pulse j
      out_ref:   (1, TB, N_tile)   phi_hat[j, batch tile, time tile]  (lane-dense in n)
    """
    # fc1 column for this pulse: periodic(t_k/T - n), time samples on lanes only.
    n_base = pl.program_id(2) * N_tile
    n_idx = (lax.broadcasted_iota(jnp.int32, (TB, N_tile), 1) + n_base).astype(jnp.float32)
    f = tk_ref[0] / jnp.float32(T) - n_idx                   # (TB, N_tile)
    if periodic:
        f = jnp.remainder(f, jnp.float32(N))                 # periodicSamp

    shift_col = shift_ref[0]                                 # (KN, 1) knots on sublanes
    c_col = c_ref[0]                                         # (KN, 1)

    rows = []
    for b in range(TB):                                      # TB is small & static
        f_b = f[b:b + 1, :]                                  # (1, N_tile)
        acc = jnp.zeros((1, N_tile), jnp.float32)
        # Chunk the knot axis so the (chunk, N_tile) ReLU slab stays VMEM-bounded
        # even for large N*resolution.  Pure VPU add/mul + XLU sublane reduce
        # (contraction width << 128, so the MXU is deliberately skipped).
        for m0 in range(0, KN, M_CHUNK):
            m1 = min(m0 + M_CHUNK, KN)
            a = jnp.maximum(f_b + shift_col[m0:m1], 0.0)     # (mc, N_tile)
            acc = acc + jnp.sum(a * c_col[m0:m1], axis=0, keepdims=True)
        rows.append(acc)
    out = jnp.concatenate(rows, axis=0) + b3_ref[0]          # (TB, N_tile)
    out_ref[...] = out[None].astype(out_ref.dtype)


def decoder_relu_net(t_k_hat, shifts_p, coeffs_p, inits_p, *, N, T, periodic):
    """Pallas forward of decoderReLUNet.  t_k_hat: (B, K_total) float32.

    Returns phi_hat of shape (B, N, K_total), matching the PyTorch module.
    """
    B, K_total = t_k_hat.shape
    KN = int(shifts_p.shape[1])

    # Time-sample tile: multiple of 128 (lane-dense) or the full N.
    if N % 128 == 0:
        N_tile = min(N, 512)
        while N % N_tile:
            N_tile //= 2
    else:
        N_tile = N
    # Batch tile: full batch for small B, chunks of 8 otherwise.
    TB = 8 if (B >= 8 and B % 8 == 0) else B
    n_grid = N // N_tile
    b_grid = B // TB
    M_CHUNK = min(KN, 2048)

    # Pulse-major, time-on-lanes layout for the kernel.
    tk_t = jnp.transpose(t_k_hat.astype(jnp.float32), (1, 0))[:, :, None]  # (K_total, B, 1)

    kernel = functools.partial(_decoder_relu_kernel, N=N, T=float(T), N_tile=N_tile,
                               TB=TB, KN=KN, M_CHUNK=M_CHUNK, periodic=periodic)

    out_t = pl.pallas_call(
        kernel,
        out_shape=jax.ShapeDtypeStruct((K_total, B, N), jnp.float32),
        grid=(K_total, b_grid, n_grid),
        in_specs=[
            pl.BlockSpec((1, TB, 1), lambda j, bi, ni: (j, bi, 0)),
            pl.BlockSpec((1, KN, 1), lambda j, bi, ni: (j, 0, 0)),
            pl.BlockSpec((1, KN, 1), lambda j, bi, ni: (j, 0, 0)),
            pl.BlockSpec((1, 1, 1), lambda j, bi, ni: (j, 0, 0)),
        ],
        out_specs=pl.BlockSpec((1, TB, N_tile), lambda j, bi, ni: (j, bi, ni)),
        compiler_params=pltpu.CompilerParams(
            dimension_semantics=("parallel", "parallel", "parallel"),
            vmem_limit_bytes=32 * 1024 * 1024),
    )(tk_t, shifts_p, coeffs_p, inits_p)

    # (K_total, B, N) -> (B, N, K_total): wrapper-side layout plumbing only.
    return jnp.transpose(out_t, (1, 2, 0))


# ---------------------------------------------------------------------------
# Pure-JAX reference (mirrors the PyTorch forward exactly, dense block-diag path)
# ---------------------------------------------------------------------------

def decoder_relu_net_ref(t_k_hat, w1t, b1, w3t, b3, *, N, T, periodic):
    n_vec = jnp.arange(N, dtype=jnp.float32)                 # utils_model.nVec(N)
    fc1 = t_k_hat[:, :, None] / T - n_vec                    # (B, K_total, N)
    if periodic:
        fc1 = jnp.remainder(fc1, float(N))
    fc1 = jnp.swapaxes(fc1, -1, -2)                          # (B, N, K_total)
    fc2 = jax.nn.relu(
        jnp.matmul(fc1, w1t, precision=jax.lax.Precision.HIGHEST) + b1)
    return jnp.matmul(fc2, w3t, precision=jax.lax.Precision.HIGHEST) + b3


# ---------------------------------------------------------------------------

if __name__ == "__main__":
    # Small deterministic config: N samples, two pulse shapes K=(2,1) -> K_total=3.
    N = 8
    resolution = 4.0
    T = 1.0
    K = (2, 1)
    periodic = True
    B = 2

    key = jax.random.PRNGKey(0)
    key, kp, kx = jax.random.split(key, 3)

    # Parameters (deterministic, synthetic — no checkpoint load).
    (shifts_p, coeffs_p, inits_p), (w1t, b1, w3t, b3) = build_decoder_params(
        kp, N=N, K=K, resolution=resolution, train_decoder=True, norm_phi=False)
    # TODO(synk): norm_phi=True path (computePeakPhi rescale) is host-side glue in
    # build_decoder_params; disabled here to avoid near-zero-peak blowup with random c.

    K_total = int(sum(K))
    t_k_hat = jax.random.uniform(kx, (B, K_total), jnp.float32, 0.0, float(N))

    out = decoder_relu_net(t_k_hat, shifts_p, coeffs_p, inits_p,
                           N=N, T=T, periodic=periodic)
    out = jax.block_until_ready(out)

    ref = decoder_relu_net_ref(t_k_hat, w1t, b1, w3t, b3, N=N, T=T, periodic=periodic)
    assert out.shape == (B, N, K_total), out.shape
    np.testing.assert_allclose(np.asarray(out), np.asarray(ref), rtol=1e-5, atol=1e-5)
    print("KERNEL_OK")
</pallas_src>

<mosaic_0001>
module attributes {stable_mosaic.version = 11 : i64} {
  func.func @_decoder_relu_kernel(%arg0: i32, %arg1: i32, %arg2: i32, %arg3: memref<1x2x1xf32, #tpu.memory_space<vmem>>, %arg4: memref<1x33x1xf32, #tpu.memory_space<vmem>>, %arg5: memref<1x33x1xf32, #tpu.memory_space<vmem>>, %arg6: memref<1x1x1xf32, #tpu.memory_space<vmem>>, %arg7: memref<1x2x8xf32, #tpu.memory_space<vmem>>) attributes {dimension_semantics = [#tpu.dimension_semantics<parallel>, #tpu.dimension_semantics<parallel>, #tpu.dimension_semantics<parallel>], iteration_bounds = array<i64: 3, 1, 1>, scalar_prefetch = 0 : i64, scratch_operands = 0 : i64, tpu.core_type = #tpu.core_type<tc>, window_params = [{transform_indices = @transform_0, window_bounds = array<i64: 1, 2, 1>}, {transform_indices = @transform_1, window_bounds = array<i64: 1, 33, 1>}, {transform_indices = @transform_2, window_bounds = array<i64: 1, 33, 1>}, {transform_indices = @transform_3, window_bounds = array<i64: 1, 1, 1>}, {transform_indices = @transform_4, window_bounds = array<i64: 1, 2, 8>}]} {
    %c8_i32 = arith.constant 8 : i32
    %0 = arith.muli %arg2, %c8_i32 : i32
    %1 = tpu.iota {dimensions = array<i32: 1>} : vector<2x8xi32>
    %2 = vector.broadcast %0 : i32 to vector<2x8xi32>
    %3 = arith.addi %1, %2 : vector<2x8xi32>
    %4 = arith.sitofp %3 : vector<2x8xi32> to vector<2x8xf32>
    %c0 = arith.constant 0 : index
    %c0_0 = arith.constant 0 : index
    %c0_1 = arith.constant 0 : index
    %5 = vector.load %arg3[%c0, %c0_0, %c0_1] : memref<1x2x1xf32, #tpu.memory_space<vmem>>, vector<1x2x1xf32>
    %6 = vector.shape_cast %5 : vector<1x2x1xf32> to vector<2x1xf32>
    %cst = arith.constant 1.000000e+00 : f32
    %7 = vector.broadcast %cst : f32 to vector<2x1xf32>
    %8 = arith.divf %6, %7 : vector<2x1xf32>
    %9 = vector.broadcast %8 : vector<2x1xf32> to vector<2x8xf32>
    %10 = arith.subf %9, %4 : vector<2x8xf32>
    %cst_2 = arith.constant 8.000000e+00 : f32
    %11 = vector.broadcast %cst_2 : f32 to vector<2x8xf32>
    %12 = arith.remf %10, %11 : vector<2x8xf32>
    %cst_3 = arith.constant 0.000000e+00 : f32
    %13 = vector.broadcast %cst_3 : f32 to vector<2x8xf32>
    %14 = arith.cmpf one, %12, %13 : vector<2x8xf32>
    %cst_4 = arith.constant 0.000000e+00 : f32
    %15 = vector.broadcast %cst_4 : f32 to vector<2x8xf32>
    %16 = arith.cmpf olt, %12, %15 : vector<2x8xf32>
    %cst_5 = arith.constant 0.000000e+00 : f32
    %17 = arith.cmpf olt, %cst_2, %cst_5 : f32
    %18 = vector.broadcast %17 : i1 to vector<2x8xi1>
    %19 = vector.broadcast %18 : vector<2x8xi1> to vector<2x8xi1>
    %20 = arith.xori %16, %19 : vector<2x8xi1>
    %21 = arith.andi %20, %14 : vector<2x8xi1>
    %22 = vector.broadcast %cst_2 : f32 to vector<2x8xf32>
    %23 = arith.addf %12, %22 : vector<2x8xf32>
    %24 = arith.select %21, %23, %12 : vector<2x8xi1>, vector<2x8xf32>
    %c0_6 = arith.constant 0 : index
    %c0_7 = arith.constant 0 : index
    %c0_8 = arith.constant 0 : index
    %25 = vector.load %arg4[%c0_6, %c0_7, %c0_8] : memref<1x33x1xf32, #tpu.memory_space<vmem>>, vector<1x33x1xf32>
    %26 = vector.shape_cast %25 : vector<1x33x1xf32> to vector<33x1xf32>
    %c0_9 = arith.constant 0 : index
    %c0_10 = arith.constant 0 : index
    %c0_11 = arith.constant 0 : index
    %27 = vector.load %arg5[%c0_9, %c0_10, %c0_11] : memref<1x33x1xf32, #tpu.memory_space<vmem>>, vector<1x33x1xf32>
    %28 = vector.shape_cast %27 : vector<1x33x1xf32> to vector<33x1xf32>
    %29 = vector.extract_strided_slice %24 {offsets = [0, 0], sizes = [1, 8], strides = [1, 1]} : vector<2x8xf32> to vector<1x8xf32>
    %cst_12 = arith.constant 0.000000e+00 : f32
    %30 = vector.broadcast %cst_12 : f32 to vector<1x8xf32>
    %31 = vector.broadcast %29 : vector<1x8xf32> to vector<33x8xf32>
    %32 = vector.broadcast %26 : vector<33x1xf32> to vector<33x8xf32>
    %33 = arith.addf %31, %32 : vector<33x8xf32>
    %cst_13 = arith.constant 0.000000e+00 : f32
    %34 = vector.broadcast %cst_13 : f32 to vector<33x8xf32>
    %35 = arith.maximumf %33, %34 : vector<33x8xf32>
    %36 = vector.broadcast %28 : vector<33x1xf32> to vector<33x8xf32>
    %37 = arith.mulf %35, %36 : vector<33x8xf32>
    %cst_14 = arith.constant dense<0.000000e+00> : vector<8xf32>
    %38 = vector.multi_reduction <add>, %37, %cst_14 [0] : vector<33x8xf32> to vector<8xf32>
    %39 = vector.shape_cast %38 : vector<8xf32> to vector<1x8xf32>
    %40 = arith.addf %30, %39 : vector<1x8xf32>
    %41 = vector.extract_strided_slice %24 {offsets = [1, 0], sizes = [1, 8], strides = [1, 1]} : vector<2x8xf32> to vector<1x8xf32>
    %cst_15 = arith.constant 0.000000e+00 : f32
    %42 = vector.broadcast %cst_15 : f32 to vector<1x8xf32>
    %43 = vector.broadcast %41 : vector<1x8xf32> to vector<33x8xf32>
    %44 = vector.broadcast %26 : vector<33x1xf32> to vector<33x8xf32>
    %45 = arith.addf %43, %44 : vector<33x8xf32>
    %cst_16 = arith.constant 0.000000e+00 : f32
    %46 = vector.broadcast %cst_16 : f32 to vector<33x8xf32>
    %47 = arith.maximumf %45, %46 : vector<33x8xf32>
    %48 = vector.broadcast %28 : vector<33x1xf32> to vector<33x8xf32>
    %49 = arith.mulf %47, %48 : vector<33x8xf32>
    %cst_17 = arith.constant dense<0.000000e+00> : vector<8xf32>
    %50 = vector.multi_reduction <add>, %49, %cst_17 [0] : vector<33x8xf32> to vector<8xf32>
    %51 = vector.shape_cast %50 : vector<8xf32> to vector<1x8xf32>
    %52 = arith.addf %42, %51 : vector<1x8xf32>
    %53 = tpu.concatenate %40, %52 in 0 : vector<1x8xf32>, vector<1x8xf32> -> vector<2x8xf32>
    %c0_18 = arith.constant 0 : index
    %c0_19 = arith.constant 0 : index
    %c0_20 = arith.constant 0 : index
    %54 = vector.load %arg6[%c0_18, %c0_19, %c0_20] : memref<1x1x1xf32, #tpu.memory_space<vmem>>, vector<1x1x1xf32>
    %55 = vector.shape_cast %54 : vector<1x1x1xf32> to vector<1x1xf32>
    %56 = vector.broadcast %55 : vector<1x1xf32> to vector<2x8xf32>
    %57 = arith.addf %53, %56 : vector<2x8xf32>
    %58 = vector.shape_cast %57 : vector<2x8xf32> to vector<1x2x8xf32>
    %c0_21 = arith.constant 0 : index
    %c0_22 = arith.constant 0 : index
    %c0_23 = arith.constant 0 : index
    %59 = vector.load %arg7[%c0_21, %c0_22, %c0_23] : memref<1x2x8xf32, #tpu.memory_space<vmem>>, vector<1x2x8xf32>
    tpu.vector_store %arg7[%c0_21, %c0_22, %c0_23], %58 {strides = array<i32>} : memref<1x2x8xf32, #tpu.memory_space<vmem>>, vector<1x2x8xf32>,
    return
  }
  func.func @transform_0(%arg0: i32, %arg1: i32, %arg2: i32) -> (i32, i32, i32) {
    %c0_i32 = arith.constant 0 : i32
    %c0_i32_0 = arith.constant 0 : i32
    return %arg0, %arg1, %c0_i32 : i32, i32, i32
  }
  func.func @transform_1(%arg0: i32, %arg1: i32, %arg2: i32) -> (i32, i32, i32) {
    %c0_i32 = arith.constant 0 : i32
    %c0_i32_0 = arith.constant 0 : i32
    %c0_i32_1 = arith.constant 0 : i32
    return %arg0, %c0_i32, %c0_i32_0 : i32, i32, i32
  }
  func.func @transform_2(%arg0: i32, %arg1: i32, %arg2: i32) -> (i32, i32, i32) {
    %c0_i32 = arith.constant 0 : i32
    %c0_i32_0 = arith.constant 0 : i32
    %c0_i32_1 = arith.constant 0 : i32
    return %arg0, %c0_i32, %c0_i32_0 : i32, i32, i32
  }
  func.func @transform_3(%arg0: i32, %arg1: i32, %arg2: i32) -> (i32, i32, i32) {
    %c0_i32 = arith.constant 0 : i32
    %c0_i32_0 = arith.constant 0 : i32
    %c0_i32_1 = arith.constant 0 : i32
    return %arg0, %c0_i32, %c0_i32_0 : i32, i32, i32
  }
  func.func @transform_4(%arg0: i32, %arg1: i32, %arg2: i32) -> (i32, i32, i32) {
    %c0_i32 = arith.constant 0 : i32
    return %arg0, %arg1, %arg2 : i32, i32, i32
  }
}

</mosaic_0001>

<bundles_post_ra>
// kernel: tpu_custom_call.1
= control target key start
LH: loop header
LB: loop body
LE: loop exit
PB: predicated region body
PF: predicated region fallthrough
CT: control target
= control target key end

     0   :  { %9 = vsyncpa [#allocation3], 0  ;;  %s877_s0 = inlined_call_operand.vmem [shape: f32[3,2,1], index: 0, kind: input, shape index: {}]   ;;  %s878_s1 = inlined_call_operand.vmem [shape: f32[3,33,1], index: 1, kind: input, shape index: {}]   ;;  %s879_s2 = inlined_call_operand.vmem [shape: f32[3,33,1], index: 2, kind: input, shape index: {}]   ;;  %s880_s3 = inlined_call_operand.vmem [shape: f32[3,1,1], index: 3, kind: input, shape index: {}]   ;;  %s881_s4 = inlined_call_operand.hbm [shape: f32[3,2,8], index: 4, kind: output, shape index: {}]  }
   0x1   :  { %11 = vsyncpa [#allocation3 + $0x1], 0  ;;  %s759_s15 = smov 0   ;;  %s761_s16 = smov 0  }
   0x2   :  { %s763_s17 = smov 0   ;;  %s765_s18 = smov 0  }
   0x3   :  { %s767_s19 = smov 0   ;;  %s769_s20 = smov 0  }
   0x4 LB: > { %s581_s21 = sadd.s32 4294967295, %s730_s20   ;;  %s582_s22 = sadd.s32 4294967294, %s730_s20   ;;  %s730_s20 = sphi %s769_s20, %s17_s20   ;;  %s726_s19 = sphi %s767_s19, %s888_s19   ;;  %s722_s18 = sphi %s765_s18, %s887_s18   ;;  %s718_s17 = sphi %s763_s17, %s886_s17   ;;  %s714_s16 = sphi %s761_s16, %s885_s16   ;;  %s710_s15 = sphi %s759_s15, %s884_s15  }
   0x5   : > { %s36_s23 = sadd.s32 1, %s726_s19  ;;  %s153_s24 = sadd.s32 1, %s718_s17 }
   0x6   : > { %p38_p0 = scmp.ge.s32.totalorder %s36_s23, 3  ;;  %p163_p1 = scmp.ne.s32.totalorder %s718_s17, %s714_s16 }
   0x7   : > { %p164_p2 = scmp.eq.s32.totalorder %s581_s21, 2  ;;  %p169_p3 = scmp.ne.s32.totalorder %s714_s16, %s710_s15 }
   0x8   : > { %s890_s23 = smov (%p38_p0, %s36_s23), 0  ;;  %p170_p5 = scmp.eq.s32.totalorder %s582_s22, 2 }
   0x9   : > { %p799_p4 = por %p164_p2, %p163_p1  ;;  %s146_s26 = ssub.s32 %s726_s19, %s890_s23 }
   0xa   : > { %p585_p6 = scmp.ge.s32.totalorder %s730_s20, 1  ;;  %p151_p7 = scmp.eq.s32.totalorder %s146_s26, 0 }
   0xb   : > { %p806_p8 = por %p170_p5, %p169_p3  ;;  %p220_p9 = scmp.lt.s32.totalorder %s730_s20, 4 }
   0xc   : > { %s812_s28 = scalar_select %p151_p7, %s718_s17, %s153_s24  }
   0xd   : > { %p221_p10 = pnand %p585_p6, %p220_p9 }
   0xe   : > { %p261_p11 = scmp.lt.s32.totalorder (!%p221_p10), %s722_s18, 2  ;;  %s258_s26 = sand.u32 (!%p221_p10), 1, %s714_s16  }
   0xf   : > { %224 = sbr.rel (%p221_p10) target bundleno = 215 (0xd7), region = 36  ;;  %s458_s10 = scalar_lea.sflag (!%p221_p10), [#allocation3], %s258_s26 }
  0x10   : > { %s733_s12 = smov (!%p221_p10), [#allocation2]  }
  0x14   : > { %v732_v0 = vmov 0   ;;  %s262_s29 = scalar_select %p261_p11, %s722_s18, 2  ;;  %v282_v13 = vlaneseq  ;;  %vm389_vm4 = vcmask 64512   ;;  %vm397_vm5 = vcmask 57344  }
  0x15   : > { %652 = vset.pattern.permute.xlu0 %v732_v0  ;;  %653 = vset.pattern.permute.xlu1 %v732_v0  ;;  %vm442_vm6 = vcmask 1040384   ;;  %vm455_vm7 = vcmask 58368  }
  0x16   : > { %s587_s30 = sshll.u32 %s262_s29, 1  ;;  %s595_s5 = smul.u32 40, %s262_s29  ;;  %v283_v14 = vand.u32 127, %v282_v13  ;;  %v321_v26 = vshrl.u32 %v282_v13, 7 }
  0x17   : > { %s267_s8 = scalar_lea.vmem %s877_s0, %s587_s30  ;;  %s280_s24 = scalar_lea.vmem %s880_s3, %s262_s29 }
  0x18   : > { %v287_v1 = vld [vmem:[%s267_s8] sm:$0x3]  ;;  %s272_s11 = scalar_lea.vmem %s878_s1, %s595_s5  ;;  %s277_s14 = scalar_lea.vmem %s879_s2, %s595_s5  ;;  %v286_v15 = vcvt.s32.f32 %v283_v14  ;;  %v322_v32 = vsub.s32 0, %v321_v26  ;;  %v409_v33 = vsub.s32 1, %v321_v26 }
  0x19   : > { %290 = vperm.xlu0 %652, %v287_v1   ;;  %v311_v2 = vld [vmem:[%s272_s11 + $0x8] sm:$0xff]  ;;  %v310_v3 = vld [vmem:[%s272_s11] sm:$0xff]  ;;  %v312_v4 = vld [vmem:[%s272_s11 + $0x10] sm:$0xff]  ;;  %s586_s29 = sshll.u32 %s258_s26, 1  ;;  %s592_s30 = sshll.u32 %s722_s18, 5 }
  0x1a   : > { %331 = vperm.xlu1 %653, %v311_v2   ;;  %v313_v5 = vld [vmem:[%s272_s11 + $0x18] sm:$0xff]  ;;  %v315_v6 = vld [vmem:[%s277_s14] sm:$0xff]  ;;  %v316_v7 = vld [vmem:[%s277_s14 + $0x8] sm:$0xff]  ;;  %s260_s5 = scalar_lea.vmem [#allocation2], %s586_s29  ;;  %s471_s9 = scalar_lea.hbm %s881_s4, %s592_s30 }
  0x1b   : > { %v314_v8 = vld [vmem:[%s272_s11 + $0x20] sm:$0x1]  ;;  %v317_v9 = vld [vmem:[%s277_s14 + $0x10] sm:$0xff]  ;;  %v318_v10 = vld [vmem:[%s277_s14 + $0x18] sm:$0xff]  ;;  %s473_s6 = sshll.u32 %s260_s5, 4  ;;  %s658_s18 = sshll.u32 %s733_s12, 4  ;;  %s474_s6 = int_to_ptr.vmem [resolvable:$true] %s473_s6  ;;  %s659_s18 = int_to_ptr.vmem [resolvable:$false] %s658_s18 }
  0x1c   : > { %v319_v11 = vld [vmem:[%s277_s14 + $0x20] sm:$0x1]  ;;  %s654_s11 = scalar_lea.vmem %s474_s6, 32  ;;  %s660_s13 = scalar_lea.vmem %s659_s18, 64 }
  0x1d   : > { %326 = vperm.xlu0 %652, %v310_v3   ;;  %v590_v12 = vld [vmem:[%s280_s24] ss:$0 sm:$0xff]  ;;  %p655_p12 = scmp.ne.s32.totalorder %s474_s6, %s654_s11  ;;  %p661_p1 = scmp.lt.s32.totalorder %s474_s6, %s659_s18 }
  0x1e   : > { %336 = vperm.xlu1 %653, %v312_v4   ;;  %p662_p2 = scmp.lt.s32.totalorder %s660_s13, %s654_s11 }
  0x1f   : > { %p656_p13 = pnand %p655_p12, %p799_p4 }
  0x20   : > { %p663_p3 = por %p662_p2, %p661_p1 }
  0x21   : > { %341 = vperm.xlu0 %652, %v313_v5   ;;  %p657_p0 = pneg %p656_p13 }
  0x22   : > { %361 = vperm.xlu1 %653, %v315_v6  }
  0x23   : > { %p664_p5 = pnand %p663_p3, %p657_p0 }
  0x25   : > { %366 = vperm.xlu0 %652, %v316_v7  }
  0x26   : > { %346 = vperm.xlu1 %653, %v314_v8  }
  0x29   : > { %371 = vperm.xlu0 %652, %v317_v9  }
  0x2a   : > { %376 = vperm.xlu1 %653, %v318_v10  }
  0x2d   : > { %381 = vperm.xlu0 %652, %v319_v11  }
  0x2e   : > { %451 = vperm.xlu1 %653, %v590_v12  }
  0x94   : > { %v291_v16 = vpop.permute.xlu0 %290 }
  0x95   : > { %v293_v17 = vsub.f32 %v291_v16, %v286_v15  ;;  %v332_v21 = vpop.permute.xlu1 %331 }
  0x97   : > { %v294_v18 = vand.u32 2147483647, %v293_v17  ;;  %v303_v30 = vand.u32 2147483648, %v293_v17 }
  0x98   : > { %v327_v22 = vpop.permute.xlu0 %326 }
  0x99   : > { %v296_v19 = vmul.f32 0.125, %v294_v18  ;;  %v337_v25 = vpop.permute.xlu1 %336 }
  0x9b   : > { %v297_v20 = vfloor.f32 %v296_v19 }
  0x9c   : > { %v342_v28 = vpop.permute.xlu0 %341 }
  0x9d   : > { %v298_v23 = vmul.f32 8.0, %v297_v20  ;;  %v362_v35 = vpop.permute.xlu1 %361 }
  0x9f   : > { %v299_v24 = vsub.f32 %v294_v18, %v298_v23 }
  0xa0   : > { %v367_v36 = vpop.permute.xlu0 %366 }
  0xa1   : > { %vm300_vm0 = vcmp.eq.f32.partialorder %v299_v24, 8.0  ;;  %v347_v48 = vpop.permute.xlu1 %346 }
  0xa2   : > { %v301_v27 = vsel %vm300_vm0, 0.0, %v299_v24 }
  0xa3   : > { %v302_v29 = vand.u32 2147483647, %v301_v27 }
  0xa4   : > { %v372_v53 = vpop.permute.xlu0 %371 }
  0xa5   : > { %v304_v31 = vor.u32 %v303_v30, %v302_v29  ;;  %v377_v10 = vpop.permute.xlu1 %376 }
  0xa7   : > { %vm305_vm1 = vcmp.ne.f32.partialorder %v304_v31, 0.0  ;;  %vm306_vm2 = vcmp.lt.f32.partialorder %v304_v31, 0.0  ;;  %v308_v34 = vadd.f32 8.0, %v304_v31 }
  0xa8   : > { %vm307_vm3 = vmand %vm306_vm2, %vm305_vm1  ;;  %v382_v15 = vpop.permute.xlu0 %381 }
  0xa9   : > { %v309_v37 = vsel %vm307_vm3, %v308_v34, %v304_v31 }
  0xaa   : > { %v323_v38 = vrot.slane %v309_v37, %v322_v32  ;;  %v410_v39 = vrot.slane %v309_v37, %v409_v33 }
  0xac   : > { %v350_v40 = vadd.f32 %v332_v21, %v323_v38  ;;  %v412_v41 = vadd.f32 %v410_v39, %v332_v21  ;;  %v349_v42 = vadd.f32 %v327_v22, %v323_v38  ;;  %v411_v43 = vadd.f32 %v410_v39, %v327_v22 }
  0xad   : > { %v351_v44 = vadd.f32 %v337_v25, %v323_v38  ;;  %v413_v45 = vadd.f32 %v410_v39, %v337_v25  ;;  %v352_v46 = vadd.f32 %v342_v28, %v323_v38  ;;  %v414_v47 = vadd.f32 %v410_v39, %v342_v28 }
  0xae   : > { %v355_v49 = vmax.f32 %v350_v40, 0.0  ;;  %v417_v50 = vmax.f32 %v412_v41, 0.0  ;;  %v354_v51 = vmax.f32 %v349_v42, 0.0  ;;  %v416_v52 = vmax.f32 %v411_v43, 0.0  ;;  %v452_v40 = vpop.permute.xlu1 %451 }
  0xaf   : > { %v356_v54 = vmax.f32 %v351_v44, 0.0  ;;  %v418_v55 = vmax.f32 %v413_v45, 0.0  ;;  %v357_v56 = vmax.f32 %v352_v46, 0.0  ;;  %v419_v57 = vmax.f32 %v414_v47, 0.0 }
  0xb0   : > { %v384_v58 = vmul.f32 %v362_v35, %v354_v51  ;;  %v421_v59 = vmul.f32 %v416_v52, %v362_v35  ;;  %v385_v60 = vmul.f32 %v367_v36, %v355_v49  ;;  %v422_v61 = vmul.f32 %v417_v50, %v367_v36 }
  0xb1   : > { %v353_v62 = vadd.f32 %v347_v48, %v323_v38  ;;  %v415_v63 = vadd.f32 %v410_v39, %v347_v48  ;;  %v386_v0 = vmul.f32 %v372_v53, %v356_v54  ;;  %v423_v1 = vmul.f32 %v418_v55, %v372_v53 }
  0xb2   : > { %v390_v2 = vsel %vm389_vm4, %v384_v58, 0.0  ;;  %v426_v3 = vsel %vm389_vm4, %v421_v59, 0.0  ;;  %v391_v4 = vsel %vm389_vm4, %v385_v60, 0.0  ;;  %v427_v5 = vsel %vm389_vm4, %v422_v61, 0.0 }
  0xb3   : > { %v392_v6 = vadd.f32 %v391_v4, %v390_v2  ;;  %v428_v7 = vadd.f32 %v427_v5, %v426_v3  ;;  %v358_v8 = vmax.f32 %v353_v62, 0.0  ;;  %v420_v9 = vmax.f32 %v415_v63, 0.0 }
  0xb4   : > { %v393_v11 = vsel %vm389_vm4, %v386_v0, 0.0  ;;  %v429_v12 = vsel %vm389_vm4, %v423_v1, 0.0  ;;  %v387_v13 = vmul.f32 %v377_v10, %v357_v56  ;;  %v424_v14 = vmul.f32 %v419_v57, %v377_v10 }
  0xb5   : > { %v394_v16 = vadd.f32 %v393_v11, %v392_v6  ;;  %v430_v17 = vadd.f32 %v429_v12, %v428_v7  ;;  %v388_v18 = vmul.f32 %v382_v15, %v358_v8  ;;  %v425_v19 = vmul.f32 %v420_v9, %v382_v15 }
  0xb6   : > { %v395_v20 = vsel %vm389_vm4, %v387_v13, 0.0  ;;  %v431_v21 = vsel %vm389_vm4, %v424_v14, 0.0 }
  0xb7   : > { %v396_v22 = vadd.f32 %v395_v20, %v394_v16  ;;  %v432_v23 = vadd.f32 %v431_v21, %v430_v17  ;;  %v398_v24 = vsel %vm397_vm5, %v388_v18, 0.0  ;;  %v433_v25 = vsel %vm397_vm5, %v425_v19, 0.0 }
  0xb9   : > { %v399_v26 = vadd.f32 %v398_v24, %v396_v22  ;;  %v434_v27 = vadd.f32 %v433_v25, %v432_v23 }
  0xbb   : > { %v400_v28 = vrot.slane %v399_v26, 4  ;;  %v435_v29 = vrot.slane %v434_v27, 4 }
  0xbd   : > { %v401_v30 = vadd.f32 %v400_v28, %v399_v26  ;;  %v436_v31 = vadd.f32 %v435_v29, %v434_v27 }
  0xbf   : > { %v402_v32 = vrot.slane %v401_v30, 2  ;;  %v437_v33 = vrot.slane %v436_v31, 2 }
  0xc1   : > { %v403_v34 = vadd.f32 %v402_v32, %v401_v30  ;;  %v438_v35 = vadd.f32 %v437_v33, %v436_v31 }
  0xc3   : > { %v404_v36 = vrot.slane %v403_v34, 1  ;;  %v439_v37 = vrot.slane %v438_v35, 1 }
  0xc5   : > { %v405_v38 = vadd.f32 %v404_v36, %v403_v34  ;;  %v440_v39 = vadd.f32 %v439_v37, %v438_v35 }
  0xc7   : > { %v443_v41 = vsel %vm442_vm6, %v405_v38, %v440_v39 }
  0xc8   : > { %v454_v42 = vadd.f32 %v452_v40, %v443_v41 }
  0xca   : > { %456 = vst.msk [vmem:[%s260_s5] sm:$0x3] %vm455_vm7, %v454_v42 }
  0xcb   : > { %667 = shalt.err (!%p664_p5)
}
  0xcc   : > { %s668_s14 = scalar_lea.hbm %s471_s9, 32  ;;  %s672_s24 = scalar_lea.hbm %s881_s4, 96 }
  0xcd   : > { %p669_p6 = scmp.ne.s32.totalorder %s471_s9, %s668_s14  ;;  %p673_p10 = scmp.lt.s32.totalorder %s471_s9, %s881_s4 }
  0xce   : > { %p674_p11 = scmp.lt.s32.totalorder %s672_s24, %s668_s14 }
  0xcf   : > { %p670_p7 = pnand %p669_p6, %p799_p4 }
  0xd0   : > { %p675_p12 = por %p674_p11, %p673_p10 }
  0xd1   : > { %p671_p9 = pneg %p670_p7 }
  0xd3   : > { %p676_p13 = pnand %p675_p12, %p671_p9 }
  0xd5   : > { %679 = shalt.err (!%p676_p13)
}
  0xd6   : > { %596 = dma.vmem_to_hbm [thread:$0]  (%p799_p4), %s474_s6, 32, %s471_s9, %s458_s10  }
  0xd7 PF: > { %p602_p0 = scmp.ge.s32.totalorder %s730_s20, 2  ;;  %s485_s30 = sand.u32 1, %s710_s15  }
  0xd8   : > { %s486_s5 = scalar_lea.sflag [#allocation3], %s485_s30 }
  0xd9   : > { %p599_p1 = pnand %p602_p0, %p806_p8 }
  0xdb   : > { %p600_p2 = pneg %p599_p1 }
  0xdd   : > { %705 = dma.done.wait (%p600_p2), %s486_s5, 32  }
  0xde   : > { %707 = vsyncadd (%p600_p2), %s486_s5, 4294967264  ;;  %s17_s20 = sadd.s32 1, %s730_s20   ;;  %s884_s15 = smov %s714_s16 }
  0xdf   : > { %p14_p3 = scmp.ge.s32.totalorder %s17_s20, 5   ;;  %s885_s16 = smov %s718_s17 }
  0xe0   : > { %s886_s17 = smov %s812_s28  ;;  %s887_s18 = smov %s726_s19 }
  0xe1   : > { %s888_s19 = smov %s890_s23  ;;  %16 = sbr.rel (!%p14_p3) target bundleno = 4 (0x4), region = 80 }
  0xe6   :  { %491 = vsyncpa [#allocation3], 1 }
  0xe7   :  { %493 = vsyncpa [#allocation3 + $0x1], 1 }

</bundles_post_ra>
